<compile_context>
chip_gen: v6e
topology: v6e:2x2x1
jax: 0.10.0
libtpu: 0.0.40
codegen_flags: <defaults>
</compile_context>

<pallas_src>
import functools

import jax
import jax.numpy as jnp
from jax import lax
from jax.experimental import pallas as pl
from jax.experimental.pallas import tpu as pltpu


def _subpixel_conv_pallas(x_cols, w_flat, b2d, out_dtype):
    """Conv as a single lane-dense matmul per batch element.

    x_cols : (N, K, L)     im2col input; K = KH*KW*Cin, L = Ho*Wp_pad (L % 128 == 0).
    w_flat : (Cout, K)     flattened weights (same K ordering as x_cols).
    b2d    : (Cout, 1)     bias (f32).
    returns: (N, Cout, L)  channel-major, lane-dense "wide" conv output
                           (columns w >= Wo are padding garbage dropped by caller).
    """
    N, K, L = x_cols.shape
    Cout, K_w = w_flat.shape
    assert K_w == K and L % 128 == 0

    def kernel(x_ref, w_ref, b_ref, o_ref):
        # x_ref: (1, K, L)  one batch element, lane-dense spatial axis
        # w_ref: (Cout, K)
        # b_ref: (Cout, 1)
        # o_ref: (1, Cout, L)
        acc = jnp.dot(w_ref[...], x_ref[0],
                      preferred_element_type=jnp.float32)        # (Cout, L) f32
        o_ref[0] = (acc + b_ref[...]).astype(o_ref.dtype)

    cost = pl.CostEstimate(
        flops=2 * N * Cout * K * L,
        transcendentals=0,
        bytes_accessed=(x_cols.size * x_cols.dtype.itemsize
                        + w_flat.size * w_flat.dtype.itemsize
                        + b2d.size * 4
                        + N * Cout * L * jnp.dtype(out_dtype).itemsize),
    )

    return pl.pallas_call(
        kernel,
        out_shape=jax.ShapeDtypeStruct((N, Cout, L), out_dtype),
        grid_spec=pltpu.PrefetchScalarGridSpec(
            num_scalar_prefetch=0,
            grid=(N,),
            in_specs=[
                pl.BlockSpec((1, K, L), lambda n: (n, 0, 0)),
                pl.BlockSpec((Cout, K), lambda n: (0, 0)),
                pl.BlockSpec((Cout, 1), lambda n: (0, 0)),
            ],
            out_specs=pl.BlockSpec((1, Cout, L), lambda n: (n, 0, 0)),
        ),
        compiler_params=pltpu.CompilerParams(
            dimension_semantics=("parallel",)),
        cost_estimate=cost,
    )(x_cols, w_flat, b2d)


def _pixel_shuffle_nchw(y, r):
    """PixelShuffle(r), NCHW in / NCHW out (matches torch.nn.PixelShuffle)."""
    N, C, H, W = y.shape
    oc = C // (r * r)
    y = y.reshape(N, oc, r, r, H, W)
    y = jnp.transpose(y, (0, 1, 4, 2, 5, 3))
    return y.reshape(N, oc, H * r, W * r)


def subpixel_forward(x_nchw, w_oihw, bias, upscale_factor, padding,
                     compute_dtype=jnp.float32):
    """Full Subpixel forward: Conv2d(padding) + PixelShuffle, NCHW in / NCHW out."""
    N, Cin, H, W = x_nchw.shape
    Cout, Cin_w, KH, KW = w_oihw.shape
    assert Cin_w == Cin

    Hp, Wp = H + 2 * padding, W + 2 * padding
    Ho, Wo = Hp - KH + 1, Wp - KW + 1
    assert Ho > 0 and Wo > 0

    # Pad the conv width so the flattened spatial axis Ho*Wp_pad is a multiple
    # of 128 (fully lane-dense accumulator / output stores).
    Wp_pad = Wp
    while (Ho * Wp_pad) % 128 != 0:
        Wp_pad += 1
    L = Ho * Wp_pad

    # --- XLA glue: pad, kh row-stack, flatten, kw im2col, weight flatten. ----
    x_pad = jnp.pad(
        x_nchw,
        ((0, 0), (0, 0), (padding, padding), (padding, padding + Wp_pad - Wp)))
    # rows[n, kh*Cin + c, h, :] = x_pad[n, c, h + kh, :]
    rows = jnp.concatenate(
        [x_pad[:, :, kh:kh + Ho, :] for kh in range(KH)], axis=1)
    rows = rows.reshape(N, KH * Cin, L)
    # Tail lanes so the kw-shift slices below never wrap past the buffer end.
    rows = jnp.pad(rows, ((0, 0), (0, 0), (0, KW - 1)))
    # x_cols[n, kw*KH*Cin + kh*Cin + c, h*Wp_pad + w] = x_pad[n, c, h+kh, w+kw]
    x_cols = jnp.concatenate(
        [rows[:, :, kw:kw + L] for kw in range(KW)], axis=1)
    x_cols = x_cols.astype(compute_dtype)

    # w_flat[co, kw*KH*Cin + kh*Cin + c] = w_oihw[co, c, kh, kw]
    w_flat = jnp.transpose(w_oihw, (0, 3, 2, 1)).reshape(Cout, KW * KH * Cin)
    w_flat = w_flat.astype(compute_dtype)
    b2d = bias.reshape(Cout, 1).astype(jnp.float32)

    # --- Hot path: Pallas lane-dense conv GEMM + bias. -----------------------
    y_wide = _subpixel_conv_pallas(x_cols, w_flat, b2d, x_nchw.dtype)

    # --- XLA glue: drop width padding, pixel shuffle. ------------------------
    y = y_wide.reshape(N, Cout, Ho, Wp_pad)[:, :, :, :Wo]
    return _pixel_shuffle_nchw(y, upscale_factor)


def _reference(x_nchw, w_oihw, bias, upscale_factor, padding):
    """Pure-JAX reference (lax.conv) for correctness checking."""
    y = lax.conv_general_dilated(
        x_nchw, w_oihw, window_strides=(1, 1),
        padding=[(padding, padding), (padding, padding)],
        dimension_numbers=("NCHW", "OIHW", "NCHW"))
    y = y + bias[None, :, None, None]
    return _pixel_shuffle_nchw(y, upscale_factor)


if __name__ == "__main__":
    # Module config (deterministic synthetic params; no checkpoint load).
    in_channels = 4
    out_channels = 4
    upscale_factor = 2
    kernel_size = 3
    padding = 1
    cout_total = out_channels * upscale_factor ** 2

    key = jax.random.PRNGKey(0)
    kx, kw, kb = jax.random.split(key, 3)

    x = jax.random.normal(kx, (2, in_channels, 16, 16), dtype=jnp.float32)
    w = 0.1 * jax.random.normal(
        kw, (cout_total, in_channels, kernel_size, kernel_size),
        dtype=jnp.float32)
    b = 0.1 * jax.random.normal(kb, (cout_total,), dtype=jnp.float32)

    fwd = jax.jit(functools.partial(
        subpixel_forward, upscale_factor=upscale_factor, padding=padding))
    out = fwd(x, w, b)
    out = jax.block_until_ready(out)

    ref = _reference(x, w, b, upscale_factor, padding)
    assert out.shape == (2, out_channels, 32, 32), out.shape
    assert jnp.allclose(out, ref, atol=1e-4, rtol=1e-4), \
        "mismatch vs lax.conv reference"

    print("KERNEL_OK")
</pallas_src>

<mosaic_0001>
module attributes {stable_mosaic.version = 11 : i64} {
  func.func @kernel(%arg0: i32, %arg1: memref<1x36x384xf32, #tpu.memory_space<vmem>>, %arg2: memref<16x36xf32, #tpu.memory_space<vmem>>, %arg3: memref<16x1xf32, #tpu.memory_space<vmem>>, %arg4: memref<1x16x384xf32, #tpu.memory_space<vmem>>) attributes {dimension_semantics = [#tpu.dimension_semantics<parallel>], iteration_bounds = array<i64: 2>, scalar_prefetch = 0 : i64, scratch_operands = 0 : i64, tpu.core_type = #tpu.core_type<tc>, window_params = [{transform_indices = @transform_0, window_bounds = array<i64: 1, 36, 384>}, {pipeline_mode = #tpu.pipeline_mode<synchronous>, transform_indices = @transform_1, window_bounds = array<i64: 16, 36>}, {pipeline_mode = #tpu.pipeline_mode<synchronous>, transform_indices = @transform_2, window_bounds = array<i64: 16, 1>}, {transform_indices = @transform_3, window_bounds = array<i64: 1, 16, 384>}]} {
    %c0 = arith.constant 0 : index
    %c0_0 = arith.constant 0 : index
    %0 = vector.load %arg2[%c0, %c0_0] : memref<16x36xf32, #tpu.memory_space<vmem>>, vector<16x36xf32>
    %c0_1 = arith.constant 0 : index
    %c0_2 = arith.constant 0 : index
    %c0_3 = arith.constant 0 : index
    %1 = vector.load %arg1[%c0_1, %c0_2, %c0_3] : memref<1x36x384xf32, #tpu.memory_space<vmem>>, vector<1x36x384xf32>
    %2 = vector.shape_cast %1 : vector<1x36x384xf32> to vector<36x384xf32>
    %cst = arith.constant dense<0.000000e+00> : vector<16x384xf32>
    %3 = tpu.matmul %0, %2, %cst {dimension_numbers = #tpu.dot_dimension_numbers<[1], [0], [0], [1], [0, 0, 1, 1], [], []>} : vector<16x36xf32>, vector<36x384xf32>, vector<16x384xf32> -> vector<16x384xf32>
    %c0_4 = arith.constant 0 : index
    %c0_5 = arith.constant 0 : index
    %4 = vector.load %arg3[%c0_4, %c0_5] : memref<16x1xf32, #tpu.memory_space<vmem>>, vector<16x1xf32>
    %5 = vector.broadcast %4 : vector<16x1xf32> to vector<16x384xf32>
    %6 = arith.addf %3, %5 : vector<16x384xf32>
    %c0_6 = arith.constant 0 : index
    %c0_7 = arith.constant 0 : index
    %c0_8 = arith.constant 0 : index
    %7 = vector.load %arg4[%c0_6, %c0_7, %c0_8] : memref<1x16x384xf32, #tpu.memory_space<vmem>>, vector<1x16x384xf32>
    %8 = vector.shape_cast %7 : vector<1x16x384xf32> to vector<16x384xf32>
    %9 = vector.shape_cast %6 : vector<16x384xf32> to vector<1x16x384xf32>
    tpu.vector_store %arg4[%c0_6, %c0_7, %c0_8], %9 {strides = array<i32>} : memref<1x16x384xf32, #tpu.memory_space<vmem>>, vector<1x16x384xf32>,
    return
  }
  func.func @transform_0(%arg0: i32) -> (i32, i32, i32) {
    %c0_i32 = arith.constant 0 : i32
    %c0_i32_0 = arith.constant 0 : i32
    %c0_i32_1 = arith.constant 0 : i32
    return %arg0, %c0_i32, %c0_i32_0 : i32, i32, i32
  }
  func.func @transform_1(%arg0: i32) -> (i32, i32) {
    %c0_i32 = arith.constant 0 : i32
    %c0_i32_0 = arith.constant 0 : i32
    %c0_i32_1 = arith.constant 0 : i32
    return %c0_i32, %c0_i32_0 : i32, i32
  }
  func.func @transform_2(%arg0: i32) -> (i32, i32) {
    %c0_i32 = arith.constant 0 : i32
    %c0_i32_0 = arith.constant 0 : i32
    %c0_i32_1 = arith.constant 0 : i32
    return %c0_i32, %c0_i32_0 : i32, i32
  }
  func.func @transform_3(%arg0: i32) -> (i32, i32, i32) {
    %c0_i32 = arith.constant 0 : i32
    %c0_i32_0 = arith.constant 0 : i32
    %c0_i32_1 = arith.constant 0 : i32
    return %arg0, %c0_i32, %c0_i32_0 : i32, i32, i32
  }
}

</mosaic_0001>

<bundles_post_ra>
// kernel: subpixel_forward.1
= control target key start
LH: loop header
LB: loop body
LE: loop exit
PB: predicated region body
PF: predicated region fallthrough
CT: control target
= control target key end

     0   :  { %s509_s12 = smov 0   ;;  %s546_s0 = inlined_call_operand.vmem [shape: f32[2,36,384], index: 0, kind: input, shape index: {}]   ;;  %s547_s1 = inlined_call_operand.vmem [shape: f32[16,36], index: 1, kind: input, shape index: {}]   ;;  %s548_s2 = inlined_call_operand.vmem [shape: f32[16,1], index: 2, kind: input, shape index: {}]   ;;  %s549_s3 = inlined_call_operand.vmem [shape: f32[2,16,384], index: 3, kind: output, shape index: {}]  }
   0x1 LB: > { %s430_s13 = sadd.s32 4294967295, %s485_s12   ;;  %p434_p0 = scmp.ge.s32.totalorder %s485_s12, 1  ;;  %s485_s12 = sphi %s509_s12, %s13_s12  }
   0x2   : > { %p137_p1 = scmp.lt.s32.totalorder %s485_s12, 3 }
   0x4   : > { %p138_p2 = pnand %p434_p0, %p137_p1 }
   0x5   : > { %p161_p3 = scmp.lt.s32.totalorder (!%p138_p2), %s430_s13, 1 }
   0x6   : > { %141 = sbr.rel (%p138_p2) target bundleno = 228 (0xe4), region = 32 }
   0xb   : > { %v171_v0 = vld [vmem:[%s547_s1] sm:$0xff]  ;;  %vm200_vm0 = vcmask 293888   ;;  %v487_v1 = vmov 0.0   ;;  %s551_s13 = smov (!%p161_p3, %s430_s13), 1  ;;  %v488_v3 = vmov 0   ;;  %v189_v4 = vld [vmem:[%s548_s2 + $0x8] sm:$0xff] }
   0xc   : > { %281 = vmatprep.mubr.f32.mxu0 %v487_v1  ;;  %463 = vmatprep.mubr.msk.f32.mxu1 %vm200_vm0, %v171_v0  ;;  %v188_v2 = vld [vmem:[%s548_s2] sm:$0xff]  ;;  %s466_s18 = smul.u32 120, %s551_s13  ;;  %vm207_vm1 = vcmask 1043456   ;;  %v172_v20 = vld [vmem:[%s547_s1 + $0x8] sm:$0xff] }
   0xd   : > { %478 = vset.pattern.permute.xlu0 %v488_v3  ;;  %s467_s26 = smul.u32 48, %s551_s13 }
   0xe   : > { %192 = vperm.xlu0 %478, %v188_v2   ;;  %s165_s23 = scalar_lea.vmem %s546_s0, %s466_s18 }
   0xf   : > { %v186_v5 = vld [vmem:[%s165_s23 + $0x68] sm:$0xf]  ;;  %v187_v6 = vld [vmem:[%s165_s23 + $0x70] sm:$0xf]  ;;  %v185_v7 = vld [vmem:[%s165_s23 + $0x60] sm:$0xf]  ;;  %s170_s29 = scalar_lea.vmem %s549_s3, %s467_s26 }
  0x10   : > { %437 = vmatprep.subr.msk.mxu0 %vm207_vm1, %v186_v5  ;;  %453 = vmatprep.subr.msk.mxu1 %vm207_vm1, %v187_v6  ;;  %v183_v8 = vld [vmem:[%s165_s23 + $0x50] sm:$0xff]  ;;  %v184_v9 = vld [vmem:[%s165_s23 + $0x58] sm:$0xff]  ;;  %v182_v10 = vld [vmem:[%s165_s23 + $0x48] sm:$0xff] }
  0x11   : > { %438 = vmatpush1.msk.msra.mxu0 %vm207_vm1, %v185_v7  ;;  %454 = vmatpush3.msk.msra.mxu1 %vm207_vm1, %v187_v6  ;;  %v180_v11 = vld [vmem:[%s165_s23 + $0x38] sm:$0xff]  ;;  %v181_v12 = vld [vmem:[%s165_s23 + $0x40] sm:$0xff]  ;;  %v179_v13 = vld [vmem:[%s165_s23 + $0x30] sm:$0xff] }
  0x12   : > { %197 = vperm.xlu0 %478, %v189_v4   ;;  %241 = vmatprep.subr.mxu0 %v183_v8  ;;  %v177_v14 = vld [vmem:[%s165_s23 + $0x20] sm:$0xff]  ;;  %v178_v15 = vld [vmem:[%s165_s23 + $0x28] sm:$0xff]  ;;  %v176_v16 = vld [vmem:[%s165_s23 + $0x18] sm:$0xff] }
  0x13   : > { %455 = vmatprep.subr.mxu1 %v184_v9  ;;  %242 = vmatpush1.msra.mxu0 %v182_v10  ;;  %v174_v17 = vld [vmem:[%s165_s23 + $0x8] sm:$0xff]  ;;  %v175_v18 = vld [vmem:[%s165_s23 + $0x10] sm:$0xff]  ;;  %v173_v19 = vld [vmem:[%s165_s23] sm:$0xff] }
  0x14   : > { %456 = vmatpush3.msra.mxu1 %v184_v9  ;;  %243 = vmatprep.subr.mxu0 %v180_v11 }
  0x15   : > { %457 = vmatprep.subr.mxu1 %v181_v12  ;;  %244 = vmatpush1.msra.mxu0 %v179_v13 }
  0x16   : > { %458 = vmatpush3.msra.mxu1 %v181_v12  ;;  %245 = vmatprep.subr.mxu0 %v177_v14 }
  0x17   : > { %459 = vmatprep.subr.mxu1 %v178_v15  ;;  %246 = vmatpush1.msra.mxu0 %v176_v16 }
  0x18   : > { %460 = vmatpush3.msra.mxu1 %v178_v15  ;;  %247 = vmatprep.subr.mxu0 %v174_v17 }
  0x19   : > { %461 = vmatprep.subr.mxu1 %v175_v18  ;;  %248 = vmatpush1.msra.mxu0 %v173_v19 }
  0x1a   : > { %462 = vmatpush3.msra.mxu1 %v175_v18  ;;  %439 = vmatmul.mubr.msk.f32.vlgmr.msra.gmra.mxu0 %vm200_vm0, %v171_v0 }
  0x1b   : > { %464 = vmatmul.mubr.msk.f32.vlgmr.msra.gmra.mxu1 %vm200_vm0, %v172_v20  ;;  %287 = vmatprep.mubr.f32.mxu0 %v487_v1 }
  0x1e   : > { %440 = vmatmul.mubr.msk.f32.gmra.mxu0 %vm200_vm0, %v172_v20 }
  0x89   : > { %v193_v21 = vpop.permute.xlu0 %192 }
  0x8d   : > { %v198_v22 = vpop.permute.xlu0 %197 }
  0xda   : > { %v283_v23 = vpop.f32.mrf.mxu0 }
  0xdb   : > { %v465_v24 = vpop.f32.mrf.mxu1  ;;  %v284_v25 = vadd.f32 %v283_v23, %v193_v21 }
  0xdc   : > { %v366_v26 = vadd.f32 %v465_v24, %v198_v22  ;;  %v285_v27 = vpop.f32.mrf.mxu0 }
  0xdd   : > { %v360_v28 = vpop.f32.mrf.mxu1  ;;  %369 = vst [vmem:[%s170_s29] sm:$0xff] %v284_v25  ;;  %v286_v29 = vadd.f32 %v285_v27, %v193_v21 }
  0xde   : > { %374 = vst [vmem:[%s170_s29 + $0x28] sm:$0xff] %v366_v26  ;;  %v361_v30 = vadd.f32 %v360_v28, %v193_v21  ;;  %v289_v31 = vpop.f32.mrf.mxu0 }
  0xdf   : > { %370 = vst [vmem:[%s170_s29 + $0x8] sm:$0xff] %v286_v29  ;;  %v290_v32 = vadd.f32 %v289_v31, %v198_v22 }
  0xe0   : > { %371 = vst [vmem:[%s170_s29 + $0x10] sm:$0xff] %v361_v30  ;;  %v291_v33 = vpop.f32.mrf.mxu0 }
  0xe1   : > { %372 = vst [vmem:[%s170_s29 + $0x18] sm:$0xff] %v290_v32  ;;  %v292_v34 = vadd.f32 %v291_v33, %v198_v22 }
  0xe3   : > { %373 = vst [vmem:[%s170_s29 + $0x20] sm:$0xff] %v292_v34 }
  0xe4 PF: > { %s13_s12 = sadd.s32 1, %s485_s12  }
  0xe5   : > { %p10_p4 = scmp.ge.s32.totalorder %s13_s12, 4  }
  0xe7   :  { %12 = sbr.rel (!%p10_p4) target bundleno = 1 (0x1), region = 62 }

</bundles_post_ra>
